<compile_context>
chip_gen: v7x
topology: tpu7x:2x2x1
jax: 0.10.0
libtpu: 0.0.40
codegen_flags: <defaults>
</compile_context>

<pallas_src>
import math
import functools

import jax
import jax.numpy as jnp
from jax.experimental import pallas as pl
from jax.experimental.pallas import tpu as pltpu

LANE = 128      # vreg lane width
SUBLANE = 8     # f32 sublane count


def _pe_kernel(*refs, p, dropout, strides, block_shape, thr):
    """Elementwise hot path: x + pe (+ inverted dropout when training)."""
    if dropout:
        seed_ref, x_ref, pe_ref, o_ref = refs
    else:
        seed_ref = None
        x_ref, pe_ref, o_ref = refs

    y = x_ref[...] + pe_ref[...]           # pe is already x.dtype; broadcasts over dim 0
    if dropout:
        if p >= 1.0:
            y = jnp.zeros_like(y)
        else:
            # Counter-based keep mask hashed from the global flattened element index.
            # TODO(synk): RNG stream will not bitwise-match torch.nn.Dropout (Philox).
            off = jnp.uint32(0)
            for ax, stride in enumerate(strides):
                off = off + pl.program_id(ax).astype(jnp.uint32) * jnp.uint32(stride & 0xFFFFFFFF)
            nrow, ncol = block_shape[-2], block_shape[-1]
            i0 = jax.lax.broadcasted_iota(jnp.int32, block_shape, 0).astype(jnp.uint32)
            i1 = jax.lax.broadcasted_iota(jnp.int32, block_shape, 1).astype(jnp.uint32)
            i2 = jax.lax.broadcasted_iota(jnp.int32, block_shape, 2).astype(jnp.uint32)
            idx = off + i0 * jnp.uint32(nrow * ncol) + i1 * jnp.uint32(ncol) + i2
            h = idx * jnp.uint32(0x9E3779B1) + seed_ref[0].astype(jnp.uint32)
            h = h ^ (h >> 16)
            h = h * jnp.uint32(0x85EBCA6B)
            h = h ^ (h >> 13)
            h = h * jnp.uint32(0xC2B2AE35)
            h = h ^ (h >> 16)
            keep = h >= jnp.uint32(thr)                      # keep with prob (1 - p)
            scale = jnp.asarray(1.0 / (1.0 - p), dtype=y.dtype)
            y = jnp.where(keep, y * scale, jnp.zeros_like(y))
    o_ref[...] = y.astype(o_ref.dtype)


def make_positional_encoding(seq_length: int, d_model: int, dtype=jnp.float32):
    """Deterministic buffer setup, identical math to the PyTorch __init__."""
    position = jnp.arange(seq_length, dtype=jnp.float32)[:, None]               # (S, 1)
    div_term = jnp.exp(
        jnp.arange(0, d_model, 2, dtype=jnp.float32) * (-math.log(10000.0) / d_model)
    )                                                                            # (D/2,)
    pe = jnp.zeros((seq_length, d_model), dtype=jnp.float32)
    pe = pe.at[:, 0::2].set(jnp.sin(position * div_term))
    pe = pe.at[:, 1::2].set(jnp.cos(position * div_term))
    return pe[None, :, :].astype(dtype)                                          # (1, L, D)


def _pe_rows_view(pe, S, D, L, block_rows):
    """(1, L, D) PE -> lane-dense (1, rows, 128) view legal for a block of `block_rows` rows."""
    if (L * D) % LANE == 0 and (block_rows % SUBLANE == 0 or block_rows == (L * D) // LANE):
        return pe.reshape(1, (L * D) // LANE, LANE)          # free metadata reshape
    return pe[:, :S, :].reshape(1, (S * D) // LANE, LANE)    # small one-time slice copy


def positional_embedding(x, pe, *, p: float = 0.1, training: bool = False, seed: int = 0,
                         target_block_bytes: int = 2 << 20, donate_x: bool = False):
    """x: (B, S, D); pe: (1, L, D) with L >= S.  Returns x + pe[:, :S, :] (+ dropout)."""
    B, S, D = x.shape
    _, L, Dp = pe.shape
    assert Dp == D and L >= S
    pe = pe.astype(x.dtype)            # cast once: no per-step convert, fewer PE DMA bytes
    itemsize = jnp.dtype(x.dtype).itemsize
    dropout = bool(training) and float(p) > 0.0
    flat = S * D

    if flat % LANE == 0:
        R = flat // LANE                                    # lane-dense rows per batch
        per_batch_bytes = R * LANE * itemsize
        if per_batch_bytes <= target_block_bytes:
            # ---- batch-blocked path: (TB, R, 128) per step, PE broadcast in-kernel ----
            TB = max(1, min(B, target_block_bytes // per_batch_bytes))
            x_in = x.reshape(B, R, LANE)                    # free contiguous reshape
            pe_in = _pe_rows_view(pe, S, D, L, R)
            grid = (pl.cdiv(B, TB),)
            blk = (TB, R, LANE)
            in_specs = [pl.BlockSpec(blk, lambda i, *_: (i, 0, 0)),
                        pl.BlockSpec((1, R, LANE), lambda i, *_: (0, 0, 0))]
            out_specs = pl.BlockSpec(blk, lambda i, *_: (i, 0, 0))
            out_flat = (B, R, LANE)
            strides = (TB * R * LANE,)
            x_blk_bytes = TB * R * LANE * itemsize
            pe_blk_bytes = R * LANE * itemsize
        else:
            # ---- row-tiled path: (1, TR, 128) per step; grid (rows, batch) with the
            #      batch axis fastest so the batch-invariant PE block stays resident ----
            tr = max(SUBLANE,
                     (target_block_bytes // (LANE * itemsize)) // SUBLANE * SUBLANE)
            TR = tr if tr < R else R
            x_in = x.reshape(B, R, LANE)
            pe_in = _pe_rows_view(pe, S, D, L, TR)
            grid = (pl.cdiv(R, TR), B)
            blk = (1, TR, LANE)
            in_specs = [pl.BlockSpec(blk, lambda j, b, *_: (b, j, 0)),
                        pl.BlockSpec(blk, lambda j, b, *_: (0, j, 0))]
            out_specs = pl.BlockSpec(blk, lambda j, b, *_: (b, j, 0))
            out_flat = (B, R, LANE)
            strides = (TR * LANE, R * LANE)
            x_blk_bytes = TR * LANE * itemsize
            pe_blk_bytes = TR * LANE * itemsize
    else:
        # ---- lane-sparse fallback (S*D not a multiple of 128): block several batches
        #      per step; stores stay lane-masked but the per-step cost is amortized ----
        per_batch_bytes = flat * itemsize
        TB = max(1, min(B, target_block_bytes // max(1, per_batch_bytes)))
        x_in = x
        pe_in = pe[:, :S, :]
        grid = (pl.cdiv(B, TB),)
        blk = (TB, S, D)
        in_specs = [pl.BlockSpec(blk, lambda i, *_: (i, 0, 0)),
                    pl.BlockSpec((1, S, D), lambda i, *_: (0, 0, 0))]
        out_specs = pl.BlockSpec(blk, lambda i, *_: (i, 0, 0))
        out_flat = (B, S, D)
        strides = (TB * S * D,)
        x_blk_bytes = TB * S * D * itemsize
        pe_blk_bytes = S * D * itemsize

    thr = min(int(round(float(p) * 4294967296.0)), 4294967295)
    kernel = functools.partial(_pe_kernel, p=float(p), dropout=dropout,
                               strides=strides, block_shape=blk, thr=thr)

    # x/out double-buffered + PE block + headroom; capped so it is v7x (64 MiB VMEM) safe.
    vmem_limit = int(min(40 << 20, 2 * (2 * x_blk_bytes + pe_blk_bytes) + (4 << 20)))

    if dropout:
        num_prefetch = 1                                  # dropout seed lives in SMEM
        args = (jnp.array([seed], jnp.int32), x_in, pe_in)
        io_alias = {}
    else:
        num_prefetch = 0                                  # eval path: no seed operand
        args = (x_in, pe_in)
        io_alias = {0: 0} if donate_x else {}             # optional: write back into x

    out = pl.pallas_call(
        kernel,
        out_shape=jax.ShapeDtypeStruct(out_flat, x.dtype),
        grid_spec=pltpu.PrefetchScalarGridSpec(
            num_scalar_prefetch=num_prefetch,
            grid=grid,
            in_specs=in_specs,
            out_specs=out_specs,
        ),
        compiler_params=pltpu.CompilerParams(
            dimension_semantics=("parallel",) * len(grid),
            vmem_limit_bytes=vmem_limit,
        ),
        input_output_aliases=io_alias,
    )(*args)
    return out.reshape(B, S, D)


if __name__ == "__main__":
    # Module config per the PyTorch spec: d_model=32, seq_length=16, dropout=0.1;
    # input x of (batch=2, seq=8, d_model=32) (seq < seq_length).
    d_model, seq_length, dropout_p = 32, 16, 0.1
    B, S = 2, 8

    key = jax.random.PRNGKey(0)
    k1, k2, k3, k4, k5 = jax.random.split(key, 5)

    x = jax.random.normal(k1, (B, S, d_model), dtype=jnp.float32)
    pe = make_positional_encoding(seq_length, d_model, dtype=jnp.float32)
    ref = x + pe[:, :S, :]

    # 1) eval-mode forward (dropout = identity): batch-blocked lane-dense path.
    out = jax.block_until_ready(positional_embedding(x, pe, p=dropout_p, training=False))
    assert out.shape == (B, S, d_model) and out.dtype == x.dtype
    assert jnp.allclose(out, ref, atol=1e-6, rtol=1e-6)

    # 2) eval-mode, row-tiled path (PE residency, dense 8x128 tiles, grid=(4, 2)).
    d2, L2, S2 = 128, 32, 32
    x2 = jax.random.normal(k2, (B, S2, d2), dtype=jnp.float32)
    pe2 = make_positional_encoding(L2, d2, dtype=jnp.float32)
    out2 = jax.block_until_ready(
        positional_embedding(x2, pe2, p=dropout_p, training=False,
                             target_block_bytes=8 * LANE * 4))
    assert jnp.allclose(out2, x2 + pe2[:, :S2, :], atol=1e-6, rtol=1e-6)

    # 3) eval-mode, non-divisible row count (partial last row block, masked stores).
    S3 = 20
    x3 = jax.random.normal(k3, (B, S3, d2), dtype=jnp.float32)
    out3 = jax.block_until_ready(
        positional_embedding(x3, pe2, p=dropout_p, training=False,
                             target_block_bytes=8 * LANE * 4))
    assert jnp.allclose(out3, x3 + pe2[:, :S3, :], atol=1e-6, rtol=1e-6)

    # 4) eval-mode, partial batch block (B=3, TB=2 -> grid=(2,), masked batch tail).
    x4 = jax.random.normal(k4, (3, S, d_model), dtype=jnp.float32)
    out4 = jax.block_until_ready(
        positional_embedding(x4, pe, p=dropout_p, training=False,
                             target_block_bytes=2 * S * d_model * 4))
    assert jnp.allclose(out4, x4 + pe[:, :S, :], atol=1e-6, rtol=1e-6)

    # 5) eval-mode, lane-sparse fallback (S*D not a multiple of 128).
    d5 = 24
    x5 = jax.random.normal(k5, (B, S, d5), dtype=jnp.float32)
    pe5 = make_positional_encoding(seq_length, d5, dtype=jnp.float32)
    out5 = jax.block_until_ready(positional_embedding(x5, pe5, p=dropout_p, training=False))
    assert jnp.allclose(out5, x5 + pe5[:, :S, :], atol=1e-6, rtol=1e-6)

    # 6) training-mode forward: kept values equal ref / (1 - p), the rest are zero.
    out_tr = jax.block_until_ready(
        positional_embedding(x, pe, p=dropout_p, training=True, seed=123))
    keep_frac = float(jnp.mean((out_tr != 0).astype(jnp.float32)))
    assert 0.75 <= keep_frac <= 0.99, keep_frac
    recon = jnp.where(out_tr != 0, out_tr * (1.0 - dropout_p), ref)
    assert jnp.allclose(recon, ref, atol=1e-5, rtol=1e-5)

    # 7) dropout mask is tiling-invariant (counter-based hash on global element index).
    out_tr_small = jax.block_until_ready(
        positional_embedding(x, pe, p=dropout_p, training=True, seed=123,
                             target_block_bytes=512))
    assert jnp.array_equal(out_tr, out_tr_small)

    print("KERNEL_OK")
</pallas_src>

<mosaic_0001>
module attributes {stable_mosaic.version = 11 : i64} {
  func.func @_pe_kernel(%arg0: i32, %arg1: memref<2x2x128xf32, #tpu.memory_space<vmem>>, %arg2: memref<1x2x128xf32, #tpu.memory_space<vmem>>, %arg3: memref<2x2x128xf32, #tpu.memory_space<vmem>>) attributes {dimension_semantics = [#tpu.dimension_semantics<parallel>], iteration_bounds = array<i64: 1>, scalar_prefetch = 0 : i64, scratch_operands = 0 : i64, tpu.core_type = #tpu.core_type<tc>, window_params = [{transform_indices = @transform_0, window_bounds = array<i64: 2, 2, 128>}, {pipeline_mode = #tpu.pipeline_mode<synchronous>, transform_indices = @transform_1, window_bounds = array<i64: 1, 2, 128>}, {transform_indices = @transform_2, window_bounds = array<i64: 2, 2, 128>}]} {
    %c0 = arith.constant 0 : index
    %c0_0 = arith.constant 0 : index
    %c0_1 = arith.constant 0 : index
    %0 = vector.load %arg1[%c0, %c0_0, %c0_1] : memref<2x2x128xf32, #tpu.memory_space<vmem>>, vector<2x2x128xf32>
    %c0_2 = arith.constant 0 : index
    %c0_3 = arith.constant 0 : index
    %c0_4 = arith.constant 0 : index
    %1 = vector.load %arg2[%c0_2, %c0_3, %c0_4] : memref<1x2x128xf32, #tpu.memory_space<vmem>>, vector<1x2x128xf32>
    %2 = vector.broadcast %1 : vector<1x2x128xf32> to vector<2x2x128xf32>
    %3 = arith.addf %0, %2 : vector<2x2x128xf32>
    %c0_5 = arith.constant 0 : index
    %c0_6 = arith.constant 0 : index
    %c0_7 = arith.constant 0 : index
    %4 = vector.load %arg3[%c0_5, %c0_6, %c0_7] : memref<2x2x128xf32, #tpu.memory_space<vmem>>, vector<2x2x128xf32>
    tpu.vector_store %arg3[%c0_5, %c0_6, %c0_7], %3 {strides = array<i32>} : memref<2x2x128xf32, #tpu.memory_space<vmem>>, vector<2x2x128xf32>,
    return
  }
  func.func @transform_0(%arg0: i32) -> (i32, i32, i32) {
    %c0_i32 = arith.constant 0 : i32
    %c0_i32_0 = arith.constant 0 : i32
    %c0_i32_1 = arith.constant 0 : i32
    return %arg0, %c0_i32, %c0_i32_0 : i32, i32, i32
  }
  func.func @transform_1(%arg0: i32) -> (i32, i32, i32) {
    %c0_i32 = arith.constant 0 : i32
    %c0_i32_0 = arith.constant 0 : i32
    %c0_i32_1 = arith.constant 0 : i32
    %c0_i32_2 = arith.constant 0 : i32
    return %c0_i32, %c0_i32_0, %c0_i32_1 : i32, i32, i32
  }
  func.func @transform_2(%arg0: i32) -> (i32, i32, i32) {
    %c0_i32 = arith.constant 0 : i32
    %c0_i32_0 = arith.constant 0 : i32
    %c0_i32_1 = arith.constant 0 : i32
    return %arg0, %c0_i32, %c0_i32_0 : i32, i32, i32
  }
}

</mosaic_0001>

<bundles_post_ra>
// kernel: tpu_custom_call.1
= control target key start
LH: loop header
LB: loop body
LE: loop exit
PB: predicated region body
PF: predicated region fallthrough
CT: control target
= control target key end

     0   :  { %7 = vsyncpa [#allocation3], 0  ;;  %s154_s0 = inlined_call_operand.hbm [shape: f32[2,2,128], index: 0, kind: input, shape index: {}]   ;;  %s155_s1 = inlined_call_operand.vmem [shape: f32[1,2,128], index: 1, kind: input, shape index: {}]   ;;  %s156_s2 = inlined_call_operand.hbm [shape: f32[2,2,128], index: 2, kind: output, shape index: {}]  }
   0x1   :  { %8 = vsyncpa [#allocation4], 0  ;;  %s102_s9 = smov [#allocation2]   ;;  %s54_s13 = scalar_lea.hbm %s154_s0, 64 }
   0x2   :  { %s14_s10 = sshll.u32 %s102_s9, 4  ;;  %p55_p0 = scmp.ne.s32.totalorder %s154_s0, %s54_s13  ;;  %s15_s10 = int_to_ptr.vmem [resolvable:$true] %s14_s10 }
   0x3   :  { %p58_p1 = scmp.lt.u32.totalorder %s54_s13, %s154_s0 }
   0x5   :  { %p60_p2 = pnand %p58_p1, %p55_p0 }
   0x7   :  { %63 = shalt.err (!%p60_p2)
}
   0x8   :  { %s64_s18 = scalar_lea.vmem %s15_s10, 64  ;;  %p69_p4 = scmp.lt.s32.totalorder %s15_s10, %s15_s10 }
   0x9   :  { %p65_p3 = scmp.ne.s32.totalorder %s15_s10, %s64_s18  ;;  %p70_p5 = scmp.lt.s32.totalorder %s64_s18, %s64_s18 }
   0xb   :  { %p71_p6 = por %p70_p5, %p69_p4 }
   0xd   :  { %p72_p7 = pnand %p71_p6, %p65_p3 }
   0xf   :  { %75 = shalt.err (!%p72_p7)
}
  0x10   :  { %s103_s19 = smov 32   ;;  %s104_s20 = smov 2  }
  0x11   :  { %20 = dma.hbm_to_vmem [thread:$0]  %s154_s0, 64, %s15_s10, [#allocation3], %s103_s19, %s103_s19, %s104_s20  }
  0x12   :  { %98 = dma.done.wait [#allocation3], 64  }
  0x13   :  { %99 = vsyncadd [#allocation3], 4294967232  ;;  %s105_s23 = smov [#allocation5]   ;;  %v26_v0 = vld [vmem:[#allocation2] sm:$0x3] }
  0x14   :  { %s38_s24 = sshll.u32 %s105_s23, 4  ;;  %v28_v1 = vld [vmem:[%s155_s1] sm:$0x3]  ;;  %v27_v2 = vld [vmem:[#allocation2 + $0x2] sm:$0x3]  ;;  %s39_s24 = int_to_ptr.vmem [resolvable:$true] %s38_s24 }
  0x15   :  { %v29_v3 = vadd.f32 %v28_v1, %v26_v0  ;;  %v30_v4 = vadd.f32 %v28_v1, %v27_v2  ;;  %s76_s27 = scalar_lea.vmem %s39_s24, 64  ;;  %p81_p9 = scmp.lt.s32.totalorder %s39_s24, %s39_s24 }
  0x16   :  { %p77_p8 = scmp.ne.s32.totalorder %s39_s24, %s76_s27  ;;  %p82_p10 = scmp.lt.s32.totalorder %s76_s27, %s76_s27 }
  0x17   :  { %31 = vst [vmem:[#allocation5] sm:$0x3] %v29_v3  ;;  %32 = vst [vmem:[#allocation5 + $0x2] sm:$0x3] %v30_v4 }
  0x18   :  { %p83_p11 = por %p82_p10, %p81_p9 }
  0x1a   :  { %p84_p12 = pnand %p83_p11, %p77_p8 }
  0x1c   :  { %87 = shalt.err (!%p84_p12)
}
  0x1d   :  { %s88_s29 = scalar_lea.hbm %s156_s2, 64 }
  0x1e   :  { %p89_p13 = scmp.ne.s32.totalorder %s156_s2, %s88_s29  ;;  %p92_p0 = scmp.lt.u32.totalorder %s88_s29, %s156_s2 }
  0x20   :  { %p94_p1 = pnand %p92_p0, %p89_p13 }
  0x22   :  { %97 = shalt.err (!%p94_p1)
}
  0x23   :  { %44 = dma.vmem_to_hbm [thread:$0]  %s39_s24, 64, %s156_s2, [#allocation4], %s103_s19, %s103_s19, %s104_s20  }
  0x24   :  { %100 = dma.done.wait [#allocation4], 64  }
  0x25   :  { %101 = vsyncadd [#allocation4], 4294967232 }
  0x26   :  { %48 = vsyncpa [#allocation3], 1 }
  0x27   :  { %49 = vsyncpa [#allocation4], 1 }

</bundles_post_ra>
